<compile_context>
chip_gen: v7x
topology: tpu7x:2x2x1
jax: 0.10.0
libtpu: 0.0.40
codegen_flags: <defaults>
</compile_context>

<pallas_src>
import jax
import jax.numpy as jnp
from jax.experimental import pallas as pl
from jax.experimental.pallas import tpu as pltpu

INPUT_DIM = 4
HIDDEN_DIM = 64
OUTPUT_DIM = 6


def _lstm_fc_kernel(x_ref, wih_ref, whh_ref, b_ref, wfc_ref, bfc_ref, out_ref):
    """Hoisted input projection + fully unrolled LSTM recurrence + final Linear.

    x_ref   : (B*T, D_in)  f32   batch-major flattened input
    wih_ref : (D_in, 4H)   f32   gate-reordered [i,f,o,g], transposed
    whh_ref : (H, 4H)      f32   gate-reordered [i,f,o,g], transposed
    b_ref   : (1, 4H)      f32   b_ih + b_hh, gate-reordered
    wfc_ref : (H, OUT)     f32
    bfc_ref : (1, OUT)     f32
    out_ref : (B, OUT)     f32
    """
    BT = x_ref.shape[0]
    H = whh_ref.shape[0]
    B = out_ref.shape[0]
    T = BT // B

    # --- Hoisted input projection: one MXU matmul + one bias add for all
    # timesteps (previously re-issued inside every serial step). -------------
    x_proj = (
        jnp.dot(x_ref[...], wih_ref[...], preferred_element_type=jnp.float32)
        + b_ref[...]
    )                                   # (B*T, 4H)
    x_proj = x_proj.reshape(B, T, 4 * H)  # batch-major slabs of T(=8) sublanes

    whh = whh_ref[...]                  # keep recurrent weights in vregs

    # --- Recurrence: h/c carried in registers, loop statically unrolled. ----
    h = jnp.zeros((B, H), jnp.float32)
    c = jnp.zeros((B, H), jnp.float32)

    for t in range(T):  # T is static -> full unroll, static slices
        gates = x_proj[:, t, :] + jnp.dot(
            h, whh, preferred_element_type=jnp.float32)          # (B, 4H)
        # Gate layout (reordered in wrapper): [ i | f | o | g ]
        sig = jax.nn.sigmoid(gates[:, :3 * H])                   # i, f, o at once
        i_g = sig[:, 0 * H:1 * H]
        f_g = sig[:, 1 * H:2 * H]
        o_g = sig[:, 2 * H:3 * H]
        g_g = jnp.tanh(gates[:, 3 * H:])
        c = f_g * c + i_g * g_g
        h = o_g * jnp.tanh(c)

    # --- fc(out[:, -1, :]) ---------------------------------------------------
    out_ref[...] = (
        jnp.dot(h, wfc_ref[...], preferred_element_type=jnp.float32)
        + bfc_ref[...]
    ).astype(out_ref.dtype)


def _reorder_gates(w):
    """Reorder PyTorch's stacked gate blocks (i,f,g,o) -> (i,f,o,g) along dim0."""
    i, f, g, o = jnp.split(w, 4, axis=0)
    return jnp.concatenate([i, f, o, g], axis=0)


def drone_movement_forward(x, params):
    """x: (B, T, INPUT_DIM) float32, batch_first (PyTorch layout)."""
    B, T, D = x.shape
    assert D == INPUT_DIM

    # Free row-major flatten (no transpose / extra HBM pass).
    x_flat = x.reshape(B * T, D)

    # Pre-transpose weights to right-multiply form; reorder gates to [i,f,o,g].
    wih_t = _reorder_gates(params["w_ih"]).T                      # (D_in, 4H)
    whh_t = _reorder_gates(params["w_hh"]).T                      # (H, 4H)
    b = _reorder_gates(
        (params["b_ih"] + params["b_hh"]).reshape(4, HIDDEN_DIM)
    ).reshape(1, 4 * HIDDEN_DIM)                                  # (1, 4H)
    wfc_t = params["w_fc"].T                                      # (H, OUT)
    bfc = params["b_fc"].reshape(1, OUTPUT_DIM)                   # (1, OUT)

    vmem_spec = pl.BlockSpec(memory_space=pltpu.MemorySpace.VMEM)

    return pl.pallas_call(
        _lstm_fc_kernel,
        out_shape=jax.ShapeDtypeStruct((B, OUTPUT_DIM), jnp.float32),
        in_specs=[vmem_spec] * 6,
        out_specs=vmem_spec,
    )(x_flat, wih_t, whh_t, b, wfc_t, bfc)


def _reference_forward(x, params):
    """Pure-JAX reference matching PyTorch nn.LSTM + nn.Linear semantics."""
    B, T, _ = x.shape
    H = HIDDEN_DIM
    h = jnp.zeros((B, H), jnp.float32)
    c = jnp.zeros((B, H), jnp.float32)
    for t in range(T):
        gates = (x[:, t, :] @ params["w_ih"].T + params["b_ih"]
                 + h @ params["w_hh"].T + params["b_hh"])
        i_g = jax.nn.sigmoid(gates[:, 0 * H:1 * H])
        f_g = jax.nn.sigmoid(gates[:, 1 * H:2 * H])
        g_g = jnp.tanh(gates[:, 2 * H:3 * H])
        o_g = jax.nn.sigmoid(gates[:, 3 * H:4 * H])
        c = f_g * c + i_g * g_g
        h = o_g * jnp.tanh(c)
    return h @ params["w_fc"].T + params["b_fc"]


def init_params(key):
    """Deterministic synthetic init (PyTorch-style uniform(-1/sqrt(H), 1/sqrt(H)))."""
    ks = jax.random.split(key, 6)
    bound = 1.0 / jnp.sqrt(jnp.float32(HIDDEN_DIM))
    u = lambda k, shape: jax.random.uniform(
        k, shape, jnp.float32, minval=-bound, maxval=bound)
    return {
        "w_ih": u(ks[0], (4 * HIDDEN_DIM, INPUT_DIM)),
        "w_hh": u(ks[1], (4 * HIDDEN_DIM, HIDDEN_DIM)),
        "b_ih": u(ks[2], (4 * HIDDEN_DIM,)),
        "b_hh": u(ks[3], (4 * HIDDEN_DIM,)),
        "w_fc": u(ks[4], (OUTPUT_DIM, HIDDEN_DIM)),
        "b_fc": u(ks[5], (OUTPUT_DIM,)),
    }


if __name__ == "__main__":
    key = jax.random.PRNGKey(0)
    k_x, k_p = jax.random.split(key)

    B, T = 2, 8
    x = jax.random.normal(k_x, (B, T, INPUT_DIM), jnp.float32)
    params = init_params(k_p)

    y = drone_movement_forward(x, params)
    y = jax.block_until_ready(y)

    y_ref = _reference_forward(x, params)
    assert y.shape == (B, OUTPUT_DIM)
    assert jnp.allclose(y, y_ref, atol=1e-4, rtol=1e-4)

    print("KERNEL_OK")
</pallas_src>

<mosaic_0001>
module attributes {stable_mosaic.version = 11 : i64} {
  func.func @_lstm_fc_kernel(%arg0: memref<16x4xf32, #tpu.memory_space<vmem>>, %arg1: memref<4x256xf32, #tpu.memory_space<vmem>>, %arg2: memref<64x256xf32, #tpu.memory_space<vmem>>, %arg3: memref<1x256xf32, #tpu.memory_space<vmem>>, %arg4: memref<64x6xf32, #tpu.memory_space<vmem>>, %arg5: memref<1x6xf32, #tpu.memory_space<vmem>>, %arg6: memref<2x6xf32, #tpu.memory_space<vmem>>) attributes {dimension_semantics = [], scalar_prefetch = 0 : i64, scratch_operands = 0 : i64, tpu.core_type = #tpu.core_type<tc>} {
    %c0 = arith.constant 0 : index
    %c0_0 = arith.constant 0 : index
    %0 = vector.load %arg0[%c0, %c0_0] : memref<16x4xf32, #tpu.memory_space<vmem>>, vector<16x4xf32>
    %c0_1 = arith.constant 0 : index
    %c0_2 = arith.constant 0 : index
    %1 = vector.load %arg1[%c0_1, %c0_2] : memref<4x256xf32, #tpu.memory_space<vmem>>, vector<4x256xf32>
    %cst = arith.constant dense<0.000000e+00> : vector<16x256xf32>
    %2 = tpu.matmul %0, %1, %cst {dimension_numbers = #tpu.dot_dimension_numbers<[1], [0], [0], [1], [0, 0, 1, 1], [], []>} : vector<16x4xf32>, vector<4x256xf32>, vector<16x256xf32> -> vector<16x256xf32>
    %c0_3 = arith.constant 0 : index
    %c0_4 = arith.constant 0 : index
    %3 = vector.load %arg3[%c0_3, %c0_4] : memref<1x256xf32, #tpu.memory_space<vmem>>, vector<1x256xf32>
    %4 = vector.broadcast %3 : vector<1x256xf32> to vector<16x256xf32>
    %5 = arith.addf %2, %4 : vector<16x256xf32>
    %6 = vector.shape_cast %5 : vector<16x256xf32> to vector<2x8x256xf32>
    %c0_5 = arith.constant 0 : index
    %c0_6 = arith.constant 0 : index
    %7 = vector.load %arg2[%c0_5, %c0_6] : memref<64x256xf32, #tpu.memory_space<vmem>>, vector<64x256xf32>
    %cst_7 = arith.constant 0.000000e+00 : f32
    %8 = vector.broadcast %cst_7 : f32 to vector<2x64xf32>
    %cst_8 = arith.constant 0.000000e+00 : f32
    %9 = vector.broadcast %cst_8 : f32 to vector<2x64xf32>
    %10 = vector.extract_strided_slice %6 {offsets = [0, 0, 0], sizes = [2, 1, 256], strides = [1, 1, 1]} : vector<2x8x256xf32> to vector<2x1x256xf32>
    %11 = vector.shape_cast %10 : vector<2x1x256xf32> to vector<2x256xf32>
    %cst_9 = arith.constant dense<0.000000e+00> : vector<2x256xf32>
    %12 = tpu.matmul %8, %7, %cst_9 {dimension_numbers = #tpu.dot_dimension_numbers<[1], [0], [0], [1], [0, 0, 1, 1], [], []>} : vector<2x64xf32>, vector<64x256xf32>, vector<2x256xf32> -> vector<2x256xf32>
    %13 = arith.addf %11, %12 : vector<2x256xf32>
    %14 = vector.extract_strided_slice %13 {offsets = [0, 0], sizes = [2, 192], strides = [1, 1]} : vector<2x256xf32> to vector<2x192xf32>
    %15 = arith.negf %14 : vector<2x192xf32>
    %16 = math.exp %15 : vector<2x192xf32>
    %cst_10 = arith.constant 1.000000e+00 : f32
    %17 = vector.broadcast %cst_10 : f32 to vector<2x192xf32>
    %18 = arith.addf %17, %16 : vector<2x192xf32>
    %19 = arith.divf %17, %18 : vector<2x192xf32>
    %20 = vector.extract_strided_slice %19 {offsets = [0, 0], sizes = [2, 64], strides = [1, 1]} : vector<2x192xf32> to vector<2x64xf32>
    %21 = vector.extract_strided_slice %19 {offsets = [0, 64], sizes = [2, 64], strides = [1, 1]} : vector<2x192xf32> to vector<2x64xf32>
    %22 = vector.extract_strided_slice %19 {offsets = [0, 128], sizes = [2, 64], strides = [1, 1]} : vector<2x192xf32> to vector<2x64xf32>
    %23 = vector.extract_strided_slice %13 {offsets = [0, 192], sizes = [2, 64], strides = [1, 1]} : vector<2x256xf32> to vector<2x64xf32>
    %24 = math.tanh %23 : vector<2x64xf32>
    %25 = arith.mulf %21, %9 : vector<2x64xf32>
    %26 = arith.mulf %20, %24 : vector<2x64xf32>
    %27 = arith.addf %25, %26 : vector<2x64xf32>
    %28 = math.tanh %27 : vector<2x64xf32>
    %29 = arith.mulf %22, %28 : vector<2x64xf32>
    %30 = vector.extract_strided_slice %6 {offsets = [0, 1, 0], sizes = [2, 1, 256], strides = [1, 1, 1]} : vector<2x8x256xf32> to vector<2x1x256xf32>
    %31 = vector.shape_cast %30 : vector<2x1x256xf32> to vector<2x256xf32>
    %cst_11 = arith.constant dense<0.000000e+00> : vector<2x256xf32>
    %32 = tpu.matmul %29, %7, %cst_11 {dimension_numbers = #tpu.dot_dimension_numbers<[1], [0], [0], [1], [0, 0, 1, 1], [], []>} : vector<2x64xf32>, vector<64x256xf32>, vector<2x256xf32> -> vector<2x256xf32>
    %33 = arith.addf %31, %32 : vector<2x256xf32>
    %34 = vector.extract_strided_slice %33 {offsets = [0, 0], sizes = [2, 192], strides = [1, 1]} : vector<2x256xf32> to vector<2x192xf32>
    %35 = arith.negf %34 : vector<2x192xf32>
    %36 = math.exp %35 : vector<2x192xf32>
    %cst_12 = arith.constant 1.000000e+00 : f32
    %37 = vector.broadcast %cst_12 : f32 to vector<2x192xf32>
    %38 = arith.addf %37, %36 : vector<2x192xf32>
    %39 = arith.divf %37, %38 : vector<2x192xf32>
    %40 = vector.extract_strided_slice %39 {offsets = [0, 0], sizes = [2, 64], strides = [1, 1]} : vector<2x192xf32> to vector<2x64xf32>
    %41 = vector.extract_strided_slice %39 {offsets = [0, 64], sizes = [2, 64], strides = [1, 1]} : vector<2x192xf32> to vector<2x64xf32>
    %42 = vector.extract_strided_slice %39 {offsets = [0, 128], sizes = [2, 64], strides = [1, 1]} : vector<2x192xf32> to vector<2x64xf32>
    %43 = vector.extract_strided_slice %33 {offsets = [0, 192], sizes = [2, 64], strides = [1, 1]} : vector<2x256xf32> to vector<2x64xf32>
    %44 = math.tanh %43 : vector<2x64xf32>
    %45 = arith.mulf %41, %27 : vector<2x64xf32>
    %46 = arith.mulf %40, %44 : vector<2x64xf32>
    %47 = arith.addf %45, %46 : vector<2x64xf32>
    %48 = math.tanh %47 : vector<2x64xf32>
    %49 = arith.mulf %42, %48 : vector<2x64xf32>
    %50 = vector.extract_strided_slice %6 {offsets = [0, 2, 0], sizes = [2, 1, 256], strides = [1, 1, 1]} : vector<2x8x256xf32> to vector<2x1x256xf32>
    %51 = vector.shape_cast %50 : vector<2x1x256xf32> to vector<2x256xf32>
    %cst_13 = arith.constant dense<0.000000e+00> : vector<2x256xf32>
    %52 = tpu.matmul %49, %7, %cst_13 {dimension_numbers = #tpu.dot_dimension_numbers<[1], [0], [0], [1], [0, 0, 1, 1], [], []>} : vector<2x64xf32>, vector<64x256xf32>, vector<2x256xf32> -> vector<2x256xf32>
    %53 = arith.addf %51, %52 : vector<2x256xf32>
    %54 = vector.extract_strided_slice %53 {offsets = [0, 0], sizes = [2, 192], strides = [1, 1]} : vector<2x256xf32> to vector<2x192xf32>
    %55 = arith.negf %54 : vector<2x192xf32>
    %56 = math.exp %55 : vector<2x192xf32>
    %cst_14 = arith.constant 1.000000e+00 : f32
    %57 = vector.broadcast %cst_14 : f32 to vector<2x192xf32>
    %58 = arith.addf %57, %56 : vector<2x192xf32>
    %59 = arith.divf %57, %58 : vector<2x192xf32>
    %60 = vector.extract_strided_slice %59 {offsets = [0, 0], sizes = [2, 64], strides = [1, 1]} : vector<2x192xf32> to vector<2x64xf32>
    %61 = vector.extract_strided_slice %59 {offsets = [0, 64], sizes = [2, 64], strides = [1, 1]} : vector<2x192xf32> to vector<2x64xf32>
    %62 = vector.extract_strided_slice %59 {offsets = [0, 128], sizes = [2, 64], strides = [1, 1]} : vector<2x192xf32> to vector<2x64xf32>
    %63 = vector.extract_strided_slice %53 {offsets = [0, 192], sizes = [2, 64], strides = [1, 1]} : vector<2x256xf32> to vector<2x64xf32>
    %64 = math.tanh %63 : vector<2x64xf32>
    %65 = arith.mulf %61, %47 : vector<2x64xf32>
    %66 = arith.mulf %60, %64 : vector<2x64xf32>
    %67 = arith.addf %65, %66 : vector<2x64xf32>
    %68 = math.tanh %67 : vector<2x64xf32>
    %69 = arith.mulf %62, %68 : vector<2x64xf32>
    %70 = vector.extract_strided_slice %6 {offsets = [0, 3, 0], sizes = [2, 1, 256], strides = [1, 1, 1]} : vector<2x8x256xf32> to vector<2x1x256xf32>
    %71 = vector.shape_cast %70 : vector<2x1x256xf32> to vector<2x256xf32>
    %cst_15 = arith.constant dense<0.000000e+00> : vector<2x256xf32>
    %72 = tpu.matmul %69, %7, %cst_15 {dimension_numbers = #tpu.dot_dimension_numbers<[1], [0], [0], [1], [0, 0, 1, 1], [], []>} : vector<2x64xf32>, vector<64x256xf32>, vector<2x256xf32> -> vector<2x256xf32>
    %73 = arith.addf %71, %72 : vector<2x256xf32>
    %74 = vector.extract_strided_slice %73 {offsets = [0, 0], sizes = [2, 192], strides = [1, 1]} : vector<2x256xf32> to vector<2x192xf32>
    %75 = arith.negf %74 : vector<2x192xf32>
    %76 = math.exp %75 : vector<2x192xf32>
    %cst_16 = arith.constant 1.000000e+00 : f32
    %77 = vector.broadcast %cst_16 : f32 to vector<2x192xf32>
    %78 = arith.addf %77, %76 : vector<2x192xf32>
    %79 = arith.divf %77, %78 : vector<2x192xf32>
    %80 = vector.extract_strided_slice %79 {offsets = [0, 0], sizes = [2, 64], strides = [1, 1]} : vector<2x192xf32> to vector<2x64xf32>
    %81 = vector.extract_strided_slice %79 {offsets = [0, 64], sizes = [2, 64], strides = [1, 1]} : vector<2x192xf32> to vector<2x64xf32>
    %82 = vector.extract_strided_slice %79 {offsets = [0, 128], sizes = [2, 64], strides = [1, 1]} : vector<2x192xf32> to vector<2x64xf32>
    %83 = vector.extract_strided_slice %73 {offsets = [0, 192], sizes = [2, 64], strides = [1, 1]} : vector<2x256xf32> to vector<2x64xf32>
    %84 = math.tanh %83 : vector<2x64xf32>
    %85 = arith.mulf %81, %67 : vector<2x64xf32>
    %86 = arith.mulf %80, %84 : vector<2x64xf32>
    %87 = arith.addf %85, %86 : vector<2x64xf32>
    %88 = math.tanh %87 : vector<2x64xf32>
    %89 = arith.mulf %82, %88 : vector<2x64xf32>
    %90 = vector.extract_strided_slice %6 {offsets = [0, 4, 0], sizes = [2, 1, 256], strides = [1, 1, 1]} : vector<2x8x256xf32> to vector<2x1x256xf32>
    %91 = vector.shape_cast %90 : vector<2x1x256xf32> to vector<2x256xf32>
    %cst_17 = arith.constant dense<0.000000e+00> : vector<2x256xf32>
    %92 = tpu.matmul %89, %7, %cst_17 {dimension_numbers = #tpu.dot_dimension_numbers<[1], [0], [0], [1], [0, 0, 1, 1], [], []>} : vector<2x64xf32>, vector<64x256xf32>, vector<2x256xf32> -> vector<2x256xf32>
    %93 = arith.addf %91, %92 : vector<2x256xf32>
    %94 = vector.extract_strided_slice %93 {offsets = [0, 0], sizes = [2, 192], strides = [1, 1]} : vector<2x256xf32> to vector<2x192xf32>
    %95 = arith.negf %94 : vector<2x192xf32>
    %96 = math.exp %95 : vector<2x192xf32>
    %cst_18 = arith.constant 1.000000e+00 : f32
    %97 = vector.broadcast %cst_18 : f32 to vector<2x192xf32>
    %98 = arith.addf %97, %96 : vector<2x192xf32>
    %99 = arith.divf %97, %98 : vector<2x192xf32>
    %100 = vector.extract_strided_slice %99 {offsets = [0, 0], sizes = [2, 64], strides = [1, 1]} : vector<2x192xf32> to vector<2x64xf32>
    %101 = vector.extract_strided_slice %99 {offsets = [0, 64], sizes = [2, 64], strides = [1, 1]} : vector<2x192xf32> to vector<2x64xf32>
    %102 = vector.extract_strided_slice %99 {offsets = [0, 128], sizes = [2, 64], strides = [1, 1]} : vector<2x192xf32> to vector<2x64xf32>
    %103 = vector.extract_strided_slice %93 {offsets = [0, 192], sizes = [2, 64], strides = [1, 1]} : vector<2x256xf32> to vector<2x64xf32>
    %104 = math.tanh %103 : vector<2x64xf32>
    %105 = arith.mulf %101, %87 : vector<2x64xf32>
    %106 = arith.mulf %100, %104 : vector<2x64xf32>
    %107 = arith.addf %105, %106 : vector<2x64xf32>
    %108 = math.tanh %107 : vector<2x64xf32>
    %109 = arith.mulf %102, %108 : vector<2x64xf32>
    %110 = vector.extract_strided_slice %6 {offsets = [0, 5, 0], sizes = [2, 1, 256], strides = [1, 1, 1]} : vector<2x8x256xf32> to vector<2x1x256xf32>
    %111 = vector.shape_cast %110 : vector<2x1x256xf32> to vector<2x256xf32>
    %cst_19 = arith.constant dense<0.000000e+00> : vector<2x256xf32>
    %112 = tpu.matmul %109, %7, %cst_19 {dimension_numbers = #tpu.dot_dimension_numbers<[1], [0], [0], [1], [0, 0, 1, 1], [], []>} : vector<2x64xf32>, vector<64x256xf32>, vector<2x256xf32> -> vector<2x256xf32>
    %113 = arith.addf %111, %112 : vector<2x256xf32>
    %114 = vector.extract_strided_slice %113 {offsets = [0, 0], sizes = [2, 192], strides = [1, 1]} : vector<2x256xf32> to vector<2x192xf32>
    %115 = arith.negf %114 : vector<2x192xf32>
    %116 = math.exp %115 : vector<2x192xf32>
    %cst_20 = arith.constant 1.000000e+00 : f32
    %117 = vector.broadcast %cst_20 : f32 to vector<2x192xf32>
    %118 = arith.addf %117, %116 : vector<2x192xf32>
    %119 = arith.divf %117, %118 : vector<2x192xf32>
    %120 = vector.extract_strided_slice %119 {offsets = [0, 0], sizes = [2, 64], strides = [1, 1]} : vector<2x192xf32> to vector<2x64xf32>
    %121 = vector.extract_strided_slice %119 {offsets = [0, 64], sizes = [2, 64], strides = [1, 1]} : vector<2x192xf32> to vector<2x64xf32>
    %122 = vector.extract_strided_slice %119 {offsets = [0, 128], sizes = [2, 64], strides = [1, 1]} : vector<2x192xf32> to vector<2x64xf32>
    %123 = vector.extract_strided_slice %113 {offsets = [0, 192], sizes = [2, 64], strides = [1, 1]} : vector<2x256xf32> to vector<2x64xf32>
    %124 = math.tanh %123 : vector<2x64xf32>
    %125 = arith.mulf %121, %107 : vector<2x64xf32>
    %126 = arith.mulf %120, %124 : vector<2x64xf32>
    %127 = arith.addf %125, %126 : vector<2x64xf32>
    %128 = math.tanh %127 : vector<2x64xf32>
    %129 = arith.mulf %122, %128 : vector<2x64xf32>
    %130 = vector.extract_strided_slice %6 {offsets = [0, 6, 0], sizes = [2, 1, 256], strides = [1, 1, 1]} : vector<2x8x256xf32> to vector<2x1x256xf32>
    %131 = vector.shape_cast %130 : vector<2x1x256xf32> to vector<2x256xf32>
    %cst_21 = arith.constant dense<0.000000e+00> : vector<2x256xf32>
    %132 = tpu.matmul %129, %7, %cst_21 {dimension_numbers = #tpu.dot_dimension_numbers<[1], [0], [0], [1], [0, 0, 1, 1], [], []>} : vector<2x64xf32>, vector<64x256xf32>, vector<2x256xf32> -> vector<2x256xf32>
    %133 = arith.addf %131, %132 : vector<2x256xf32>
    %134 = vector.extract_strided_slice %133 {offsets = [0, 0], sizes = [2, 192], strides = [1, 1]} : vector<2x256xf32> to vector<2x192xf32>
    %135 = arith.negf %134 : vector<2x192xf32>
    %136 = math.exp %135 : vector<2x192xf32>
    %cst_22 = arith.constant 1.000000e+00 : f32
    %137 = vector.broadcast %cst_22 : f32 to vector<2x192xf32>
    %138 = arith.addf %137, %136 : vector<2x192xf32>
    %139 = arith.divf %137, %138 : vector<2x192xf32>
    %140 = vector.extract_strided_slice %139 {offsets = [0, 0], sizes = [2, 64], strides = [1, 1]} : vector<2x192xf32> to vector<2x64xf32>
    %141 = vector.extract_strided_slice %139 {offsets = [0, 64], sizes = [2, 64], strides = [1, 1]} : vector<2x192xf32> to vector<2x64xf32>
    %142 = vector.extract_strided_slice %139 {offsets = [0, 128], sizes = [2, 64], strides = [1, 1]} : vector<2x192xf32> to vector<2x64xf32>
    %143 = vector.extract_strided_slice %133 {offsets = [0, 192], sizes = [2, 64], strides = [1, 1]} : vector<2x256xf32> to vector<2x64xf32>
    %144 = math.tanh %143 : vector<2x64xf32>
    %145 = arith.mulf %141, %127 : vector<2x64xf32>
    %146 = arith.mulf %140, %144 : vector<2x64xf32>
    %147 = arith.addf %145, %146 : vector<2x64xf32>
    %148 = math.tanh %147 : vector<2x64xf32>
    %149 = arith.mulf %142, %148 : vector<2x64xf32>
    %150 = vector.extract_strided_slice %6 {offsets = [0, 7, 0], sizes = [2, 1, 256], strides = [1, 1, 1]} : vector<2x8x256xf32> to vector<2x1x256xf32>
    %151 = vector.shape_cast %150 : vector<2x1x256xf32> to vector<2x256xf32>
    %cst_23 = arith.constant dense<0.000000e+00> : vector<2x256xf32>
    %152 = tpu.matmul %149, %7, %cst_23 {dimension_numbers = #tpu.dot_dimension_numbers<[1], [0], [0], [1], [0, 0, 1, 1], [], []>} : vector<2x64xf32>, vector<64x256xf32>, vector<2x256xf32> -> vector<2x256xf32>
    %153 = arith.addf %151, %152 : vector<2x256xf32>
    %154 = vector.extract_strided_slice %153 {offsets = [0, 0], sizes = [2, 192], strides = [1, 1]} : vector<2x256xf32> to vector<2x192xf32>
    %155 = arith.negf %154 : vector<2x192xf32>
    %156 = math.exp %155 : vector<2x192xf32>
    %cst_24 = arith.constant 1.000000e+00 : f32
    %157 = vector.broadcast %cst_24 : f32 to vector<2x192xf32>
    %158 = arith.addf %157, %156 : vector<2x192xf32>
    %159 = arith.divf %157, %158 : vector<2x192xf32>
    %160 = vector.extract_strided_slice %159 {offsets = [0, 0], sizes = [2, 64], strides = [1, 1]} : vector<2x192xf32> to vector<2x64xf32>
    %161 = vector.extract_strided_slice %159 {offsets = [0, 64], sizes = [2, 64], strides = [1, 1]} : vector<2x192xf32> to vector<2x64xf32>
    %162 = vector.extract_strided_slice %159 {offsets = [0, 128], sizes = [2, 64], strides = [1, 1]} : vector<2x192xf32> to vector<2x64xf32>
    %163 = vector.extract_strided_slice %153 {offsets = [0, 192], sizes = [2, 64], strides = [1, 1]} : vector<2x256xf32> to vector<2x64xf32>
    %164 = math.tanh %163 : vector<2x64xf32>
    %165 = arith.mulf %161, %147 : vector<2x64xf32>
    %166 = arith.mulf %160, %164 : vector<2x64xf32>
    %167 = arith.addf %165, %166 : vector<2x64xf32>
    %168 = math.tanh %167 : vector<2x64xf32>
    %169 = arith.mulf %162, %168 : vector<2x64xf32>
    %c0_25 = arith.constant 0 : index
    %c0_26 = arith.constant 0 : index
    %170 = vector.load %arg4[%c0_25, %c0_26] : memref<64x6xf32, #tpu.memory_space<vmem>>, vector<64x6xf32>
    %cst_27 = arith.constant dense<0.000000e+00> : vector<2x6xf32>
    %171 = tpu.matmul %169, %170, %cst_27 {dimension_numbers = #tpu.dot_dimension_numbers<[1], [0], [0], [1], [0, 0, 1, 1], [], []>} : vector<2x64xf32>, vector<64x6xf32>, vector<2x6xf32> -> vector<2x6xf32>
    %c0_28 = arith.constant 0 : index
    %c0_29 = arith.constant 0 : index
    %172 = vector.load %arg5[%c0_28, %c0_29] : memref<1x6xf32, #tpu.memory_space<vmem>>, vector<1x6xf32>
    %173 = vector.broadcast %172 : vector<1x6xf32> to vector<2x6xf32>
    %174 = arith.addf %171, %173 : vector<2x6xf32>
    %c0_30 = arith.constant 0 : index
    %c0_31 = arith.constant 0 : index
    %175 = vector.load %arg6[%c0_30, %c0_31] : memref<2x6xf32, #tpu.memory_space<vmem>>, vector<2x6xf32>
    tpu.vector_store %arg6[%c0_30, %c0_31], %174 {strides = array<i32>} : memref<2x6xf32, #tpu.memory_space<vmem>>, vector<2x6xf32>,
    return
  }
}

</mosaic_0001>

<bundles_post_ra>
// kernel: tpu_custom_call.1
= control target key start
LH: loop header
LB: loop body
LE: loop exit
PB: predicated region body
PF: predicated region fallthrough
CT: control target
= control target key end

     0   :  { %11 = vsyncpa [#allocation3], 0  ;;  %s2349_s0 = inlined_call_operand.vmem [shape: f32[16,4], index: 0, kind: input, shape index: {}]   ;;  %s2350_s1 = inlined_call_operand.vmem [shape: f32[4,256], index: 1, kind: input, shape index: {}]   ;;  %s2351_s2 = inlined_call_operand.hbm [shape: f32[64,256], index: 2, kind: input, shape index: {}]   ;;  %s2352_s3 = inlined_call_operand.vmem [shape: f32[1,256], index: 3, kind: input, shape index: {}]   ;;  %s2353_s4 = inlined_call_operand.vmem [shape: f32[64,6], index: 4, kind: input, shape index: {}]   ;;  %s2354_s5 = inlined_call_operand.vmem [shape: f32[1,6], index: 5, kind: input, shape index: {}]   ;;  %s2355_s6 = inlined_call_operand.hbm [shape: f32[2,6], index: 6, kind: output, shape index: {}]  }
   0x1   :  { %12 = vsyncpa [#allocation4], 0  ;;  %s1981_s21 = smov [#allocation2]   ;;  %s1933_s25 = scalar_lea.hbm %s2351_s2, 2048 }
   0x2   :  { %s22_s22 = sshll.u32 %s1981_s21, 4  ;;  %p1934_p0 = scmp.ne.s32.totalorder %s2351_s2, %s1933_s25  ;;  %s23_s22 = int_to_ptr.vmem [resolvable:$true] %s22_s22 }
   0x3   :  { %p1937_p1 = scmp.lt.u32.totalorder %s1933_s25, %s2351_s2 }
   0x5   :  { %p1939_p2 = pnand %p1937_p1, %p1934_p0 }
   0x7   :  { %1942 = shalt.err (!%p1939_p2)
}
   0x8   :  { %s1943_s30 = scalar_lea.vmem %s23_s22, 2048  ;;  %p1948_p4 = scmp.lt.s32.totalorder %s23_s22, %s23_s22 }
   0x9   :  { %p1944_p3 = scmp.ne.s32.totalorder %s23_s22, %s1943_s30  ;;  %p1949_p5 = scmp.lt.s32.totalorder %s1943_s30, %s1943_s30 }
   0xb   :  { %p1950_p6 = por %p1949_p5, %p1948_p4 }
   0xd   :  { %p1951_p7 = pnand %p1950_p6, %p1944_p3 }
   0xf   :  { %1954 = shalt.err (!%p1951_p7)
}
  0x10   :  { %s1982_s7 = smov 256   ;;  %s1983_s8 = smov 16  }
  0x11   :  { %28 = dma.hbm_to_vmem [thread:$0]  %s2351_s2, 2048, %s23_s22, [#allocation3], %s1982_s7, %s1982_s7, %s1983_s8  }
  0x12   :  { %1977 = dma.done.wait [#allocation3], 2048  }
  0x13   :  { %1978 = vsyncadd [#allocation3], 4294965248  ;;  %v1984_v0 = vmov 0.0   ;;  %v145_v1 = vld [vmem:[#allocation2 + $0x8] sm:$0xff]  ;;  %v147_v2 = vld [vmem:[#allocation2 + $0x18] sm:$0xff]  ;;  %vm62_vm0 = vcmask 1043456   ;;  %v43_v29 = vlaneseq }
  0x14   :  { %131 = vmatprep.mubr.f32.mxu0 %v1984_v0  ;;  %228 = vmatprep.mubr.f32.mxu1 %v1984_v0  ;;  %v144_v3 = vld [vmem:[#allocation2] sm:$0xff]  ;;  %v2038_v4 = vpack.c.bf16 %v147_v2, %v145_v1  ;;  %v146_v5 = vld [vmem:[#allocation2 + $0x10] sm:$0xff]  ;;  %v149_v6 = vld [vmem:[#allocation2 + $0x28] sm:$0xff]  ;;  %vm55_vm1 = vcmask 31744   ;;  %s1985_s16 = smov 64   ;;  %vm310_vm2 = vcmask 1041409  }
  0x15   :  { %v151_v7 = vld [vmem:[#allocation2 + $0x38] sm:$0xff]  ;;  %v2040_v8 = vpack.c.bf16 %v146_v5, %v144_v3  ;;  %v148_v10 = vld [vmem:[#allocation2 + $0x20] sm:$0xff]  ;;  %v150_v11 = vld [vmem:[#allocation2 + $0x30] sm:$0xff]  ;;  %v44_v32 = vshrl.u32 %v43_v29, 7  ;;  %vm160_vm3 = vcmask 523264   ;;  %vm1987_vm4 = vmmov 0  }
  0x16   :  { %v2042_v9 = vpack.c.bf16 %v151_v7, %v149_v6  ;;  %v153_v12 = vld [vmem:[#allocation2 + $0x48] sm:$0xff]  ;;  %1593 = vmatprep.subr.bf16.mxu1 %v2038_v4  ;;  %v155_v13 = vld [vmem:[#allocation2 + $0x58] sm:$0xff]  ;;  %v40_v14 = vld [vmem:[%s2350_s1] sm:$0xff]  ;;  %v2049_v15 = vpack.c.bf16 %v150_v11, %v148_v10  ;;  %s1988_s9 = smov [#allocation5]   ;;  %vm1502_vm5 = vcmask 41984  }
  0x17   :  { %1595 = vmatpush1.bf16.msra.mxu1 %v2040_v8  ;;  %v54_v16 = vcombine.high %v40_v14, %v40_v14  ;;  %v2052_v17 = vpack.c.bf16 %v155_v13, %v153_v12  ;;  %v152_v18 = vld [vmem:[#allocation2 + $0x40] sm:$0xff]  ;;  %v154_v19 = vld [vmem:[#allocation2 + $0x50] sm:$0xff]  ;;  %v157_v21 = vld [vmem:[#allocation2 + $0x68] sm:$0xff]  ;;  %v49_v35 = vsub.s32 1, %v44_v32  ;;  %v45_v47 = vsub.s32 0, %v44_v32  ;;  %s1510_s10 = sshll.u32 %s1988_s9, 4  ;;  %s1511_s10 = int_to_ptr.vmem [resolvable:$true] %s1510_s10 }
  0x18   :  { %1597 = vmatprep.subr.bf16.mxu1 %v2042_v9  ;;  %v38_v20 = vld [vmem:[%s2349_s0] sm:$0xff]  ;;  %v159_v22 = vld [vmem:[#allocation2 + $0x78] sm:$0xff]  ;;  %v2058_v23 = vpack.c.bf16 %v154_v19, %v152_v18  ;;  %v156_v25 = vld [vmem:[#allocation2 + $0x60] sm:$0xff]  ;;  %s1955_s2 = scalar_lea.vmem %s1511_s10, 32  ;;  %p1960_p9 = scmp.lt.s32.totalorder %s1511_s10, %s1511_s10 }
  0x19   :  { %1519 = vmatprep.subr.msk.mxu0 %vm62_vm0, %v54_v16  ;;  %v2062_v24 = vpack.c.bf16 %v159_v22, %v157_v21  ;;  %v158_v26 = vld [vmem:[#allocation2 + $0x70] sm:$0xff]  ;;  %v39_v27 = vld [vmem:[%s2349_s0 + $0x8] sm:$0xff]  ;;  %p1956_p8 = scmp.ne.s32.totalorder %s1511_s10, %s1955_s2  ;;  %p1961_p10 = scmp.lt.s32.totalorder %s1955_s2, %s1955_s2 }
  0x1a   :  { %1520 = vmatpush1.msk.msra.mxu0 %vm62_vm0, %v40_v14  ;;  %v2071_v28 = vpack.c.bf16 %v158_v26, %v156_v25  ;;  %v41_v36 = vld [vmem:[%s2352_s3] sm:$0x3] }
  0x1b   :  { %1599 = vmatpush1.bf16.msra.mxu1 %v2049_v15  ;;  %1521 = vmatmul.mubr.msk.f32.vlgmr.msra.gmra.mrb[0].mxu0 %vm55_vm1, %v38_v20  ;;  %v50_v37 = vrot.slane %v41_v36, %v49_v35  ;;  %v46_v48 = vrot.slane %v41_v36, %v45_v47  ;;  %p1962_p11 = por %p1961_p10, %p1960_p9 }
  0x1c   :  { %1601 = vmatprep.subr.bf16.mxu1 %v2052_v17  ;;  %137 = vmatprep.mubr.f32.mxu0 %v1984_v0 }
  0x1d   :  { %1609 = vmatprep.subr.bf16.mxu0 %v2038_v4  ;;  %p1963_p12 = pnand %p1962_p11, %p1956_p8 }
  0x1e   :  { %1611 = vmatpush1.bf16.msra.mxu0 %v2040_v8 }
  0x1f   :  { %1603 = vmatpush1.bf16.msra.mxu1 %v2058_v23  ;;  %1522 = vmatmul.mubr.msk.f32.gmra.mrb[2].mxu0 %vm55_vm1, %v39_v27 }
  0x20   :  { %1605 = vmatprep.subr.bf16.mxu1 %v2062_v24  ;;  %1613 = vmatprep.subr.bf16.mxu0 %v2042_v9 }
  0x21   :  { %378 = vmatprep.mubr.f32.mxu0 %v1984_v0 }
  0x22   :  { %1615 = vmatpush1.bf16.msra.mxu0 %v2049_v15 }
  0x23   :  { %1607 = vmatpush1.bf16.msra.mxu1 %v2071_v28  ;;  %1617 = vmatprep.subr.bf16.mxu0 %v2052_v17 }
  0x24   :  { %1625 = vmatprep.subr.bf16.mxu1 %v2038_v4 }
  0x26   :  { %229 = vmatmul.mubr.f32.vlgmr.msra.gmra.mrb[0].mxu1 %v1984_v0  ;;  %1619 = vmatpush1.bf16.msra.mxu0 %v2058_v23 }
  0x27   :  { %1621 = vmatprep.subr.bf16.mxu0 %v2062_v24  ;;  %1627 = vmatpush1.bf16.msra.mxu1 %v2040_v8 }
  0x28   :  { %1629 = vmatprep.subr.bf16.mxu1 %v2042_v9  ;;  %533 = vmatprep.mubr.f32.mxu1 %v1984_v0 }
  0x2a   :  { %1623 = vmatpush1.bf16.msra.mxu0 %v2071_v28 }
  0x2b   :  { %1631 = vmatpush1.bf16.msra.mxu1 %v2049_v15  ;;  %1641 = vmatprep.subr.bf16.mxu0 %v2038_v4 }
  0x2c   :  { %1633 = vmatprep.subr.bf16.mxu1 %v2052_v17 }
  0x2f   :  { %1635 = vmatpush1.bf16.msra.mxu1 %v2058_v23 }
  0x30   :  { %1637 = vmatprep.subr.bf16.mxu1 %v2062_v24 }
  0x33   :  { %1639 = vmatpush1.bf16.msra.mxu1 %v2071_v28 }
  0x34   :  { %1657 = vmatprep.subr.bf16.mxu1 %v2038_v4 }
  0xee   :  { %v133_v30 = vpop.f32.mrb[0].mxu0 }
  0xef   :  { %v135_v31 = vpop.f32.mrb[1].mxu0  ;;  %v2109_v52 = vadd.f32 %v133_v30, %v46_v48 }
  0xf0   :  { %v2101_v43 = vadd.f32 %v135_v31, %v50_v37 }
  0xf2   :  { %v139_v33 = vpop.f32.mrb[2].mxu0 }
  0xf3   :  { %v141_v34 = vpop.f32.mrb[3].mxu0  ;;  %v2106_v49 = vadd.f32 %v139_v33, %v46_v48 }
  0xf4   :  { %v2098_v39 = vadd.f32 %v141_v34, %v50_v37 }
  0xf9   :  { %v230_v38 = vpop.f32.mrb[0].mxu1 }
  0xfa   :  { %v232_v40 = vpop.f32.mrb[1].mxu1  ;;  %v237_v50 = vrot.slane %v230_v38, 1  ;;  %v243_v53 = vadd.f32 %v230_v38, %v2109_v52 }
  0xfb   :  { %v238_v41 = vrot.slane %v232_v40, 1  ;;  %v244_v44 = vadd.f32 %v232_v40, %v2101_v43 }
  0xfc   :  { %v245_v51 = vadd.f32 %v237_v50, %v2106_v49  ;;  %v1523_v55 = vmul.f32 -1.442695, %v243_v53 }
  0xfd   :  { %v246_v42 = vadd.f32 %v238_v41, %v2098_v39  ;;  %v1524_v16 = vmul.f32 -1.442695, %v244_v44 }
  0xfe   :  { %v1525_v54 = vmul.f32 -1.442695, %v245_v51 }
  0xff   :  { %1741 = vtanh.f32 %v246_v42  ;;  %v1526_v14 = vmul.f32 -1.442695, %v246_v42 }
 0x100   :  { %1743 = vtanh.f32 %v244_v44 }
 0x101   :  { %1745 = vpow2.f32 %v1525_v54 }
 0x102   :  { %1747 = vpow2.f32 %v1523_v55 }
 0x109   :  { %v1742_v45 = vpop.eup %1741 }
 0x10a   :  { %279 = vrot.lane.b32.xlu0 %v1742_v45, %s1985_s16  ;;  %v1744_v46 = vpop.eup %1743 }
 0x10b   :  { %v1746_v56 = vpop.eup %1745 }
 0x10c   :  { %v261_v57 = vadd.f32 1.0, %v1746_v56  ;;  %v1748_v58 = vpop.eup %1747 }
 0x10d   :  { %v259_v59 = vadd.f32 1.0, %v1748_v58 }
 0x10e   :  { %277 = vrot.lane.b32.xlu0 %v1744_v46, %s1985_s16  ;;  %1749 = vrcp.f32 %v261_v57 }
 0x10f   :  { %1751 = vrcp.f32 %v259_v59 }
 0x118   :  { %v1750_v60 = vpop.eup %1749 }
 0x119   :  { %v1752_v63 = vpop.eup %1751  ;;  %v274_v3 = vmul.f32 0.0, %v1750_v60 }
 0x11a   :  { %v273_v7 = vmul.f32 0.0, %v1752_v63 }
 0x17c   :  { %v280_v61 = vpop.permute.xlu0 %279 }
 0x17d   :  { %v284_v62 = vmul.f32 %v1750_v60, %v280_v61 }
 0x17f   :  { %289 = vrot.lane.b32.xlu1 %v284_v62, %s1985_s16 }
 0x180   :  { %v278_v1 = vpop.permute.xlu0 %277 }
 0x181   :  { %v283_v2 = vmul.f32 %v1752_v63, %v278_v1 }
 0x183   :  { %287 = vrot.lane.b32.xlu1 %v283_v2, %s1985_s16 }
 0x1f1   :  { %v290_v5 = vpop.permute.xlu1 %289 }
 0x1f2   :  { %v2114_v6 = vadd.f32 %v290_v5, %v274_v3 }
 0x1f4   :  { %1753 = vtanh.f32 %v2114_v6  ;;  %v426_v59 = vrot.slane %v2114_v6, 7 }
 0x1f5   :  { %v288_v10 = vpop.permute.xlu1 %287 }
 0x1f6   :  { %v2117_v11 = vadd.f32 %v288_v10, %v273_v7 }
 0x1f8   :  { %1755 = vtanh.f32 %v2117_v11  ;;  %v425_v63 = vrot.slane %v2117_v11, 7 }
 0x1f9   :  { %1757 = vpow2.f32 %v1526_v14 }
 0x1fa   :  { %1759 = vpow2.f32 %v1524_v16 }
 0x1fe   :  { %v1754_v12 = vpop.eup %1753 }
 0x1ff   :  { %301 = vrot.lane.b32.xlu0 %v1754_v12, %s1985_s16 }
 0x202   :  { %v1756_v13 = vpop.eup %1755 }
 0x203   :  { %299 = vrot.lane.b32.xlu1 %v1756_v13, %s1985_s16  ;;  %v1758_v18 = vpop.eup %1757 }
 0x204   :  { %v262_v19 = vadd.f32 1.0, %v1758_v18  ;;  %v1760_v20 = vpop.eup %1759 }
 0x205   :  { %v260_v21 = vadd.f32 1.0, %v1760_v20 }
 0x206   :  { %1761 = vrcp.f32 %v262_v19 }
 0x207   :  { %1763 = vrcp.f32 %v260_v21 }
 0x210   :  { %v1762_v22 = vpop.eup %1761 }
 0x211   :  { %v1764_v27 = vpop.eup %1763 }
 0x271   :  { %v302_v25 = vpop.permute.xlu0 %301 }
 0x272   :  { %v306_v26 = vmul.f32 %v1762_v22, %v302_v25 }
 0x274   :  { %v309_v30 = vrot.slane %v306_v26, 7 }
 0x275   :  { %v300_v29 = vpop.permute.xlu1 %299 }
 0x276   :  { %v305_v31 = vmul.f32 %v1764_v27, %v300_v29 }
 0x278   :  { %v311_v32 = vsel %vm310_vm2, %v309_v30, %v305_v31 }
 0x279   :  { %1527 = vmatmul.mubr.msk.f32.vlgmr.msra.gmra.mrb[4].mxu0 %vm160_vm3, %v311_v32 }
 0x27a   :  { %1643 = vmatpush1.bf16.msra.mxu0 %v2040_v8  ;;  %691 = vmatprep.mubr.f32.mxu0 %v1984_v0 }
 0x27b   :  { %1645 = vmatprep.subr.bf16.mxu0 %v2042_v9 }
 0x27e   :  { %1647 = vmatpush1.bf16.msra.mxu0 %v2049_v15 }
 0x27f   :  { %1649 = vmatprep.subr.bf16.mxu0 %v2052_v17 }
 0x282   :  { %1651 = vmatpush1.bf16.msra.mxu0 %v2058_v23 }
 0x283   :  { %1653 = vmatprep.subr.bf16.mxu0 %v2062_v24 }
 0x286   :  { %1655 = vmatpush1.bf16.msra.mxu0 %v2071_v28 }
 0x287   :  { %1673 = vmatprep.subr.bf16.mxu0 %v2038_v4 }
 0x34c   :  { %v380_v33 = vpop.f32.mrb[4].mxu0 }
 0x34d   :  { %v382_v34 = vpop.f32.mrb[5].mxu0  ;;  %v395_v41 = vadd.f32 %v380_v33, %v2106_v49  ;;  %v387_v42 = vrot.slane %v380_v33, 7 }
 0x34e   :  { %v388_v35 = vrot.slane %v382_v34, 7  ;;  %v396_v36 = vadd.f32 %v382_v34, %v2098_v39 }
 0x34f   :  { %v1530_v44 = vmul.f32 -1.442695, %v395_v41  ;;  %v393_v45 = vadd.f32 %v387_v42, %v2109_v52 }
 0x350   :  { %1765 = vtanh.f32 %v396_v36  ;;  %v394_v37 = vadd.f32 %v388_v35, %v2101_v43  ;;  %v1531_v10 = vmul.f32 -1.442695, %v396_v36 }
 0x351   :  { %v1528_v46 = vmul.f32 -1.442695, %v393_v45 }
 0x352   :  { %1767 = vtanh.f32 %v394_v37  ;;  %v1529_v6 = vmul.f32 -1.442695, %v394_v37 }
 0x353   :  { %1769 = vpow2.f32 %v1530_v44 }
 0x354   :  { %1771 = vpow2.f32 %v1528_v46 }
 0x35a   :  { %v1766_v38 = vpop.eup %1765 }
 0x35b   :  { %435 = vrot.lane.b32.xlu1 %v1766_v38, %s1985_s16 }
 0x35c   :  { %v1768_v40 = vpop.eup %1767 }
 0x35d   :  { %433 = vrot.lane.b32.xlu0 %v1768_v40, %s1985_s16  ;;  %v1770_v47 = vpop.eup %1769 }
 0x35e   :  { %v411_v48 = vadd.f32 1.0, %v1770_v47  ;;  %v1772_v50 = vpop.eup %1771 }
 0x35f   :  { %v409_v51 = vadd.f32 1.0, %v1772_v50 }
 0x360   :  { %1773 = vrcp.f32 %v411_v48 }
 0x361   :  { %1775 = vrcp.f32 %v409_v51 }
 0x36a   :  { %v1774_v53 = vpop.eup %1773 }
 0x36b   :  { %v1776_v56 = vpop.eup %1775  ;;  %v430_v60 = vmul.f32 %v1774_v53, %v426_v59 }
 0x36c   :  { %v429_v1 = vmul.f32 %v1776_v56, %v425_v63 }
 0x3cd   :  { %v436_v54 = vpop.permute.xlu1 %435 }
 0x3ce   :  { %v440_v55 = vmul.f32 %v1774_v53, %v436_v54 }
 0x3cf   :  { %v434_v57 = vpop.permute.xlu0 %433 }
 0x3d0   :  { %445 = vrot.lane.b32.xlu1 %v440_v55, %s1985_s16  ;;  %v439_v58 = vmul.f32 %v1776_v56, %v434_v57 }
 0x3d2   :  { %443 = vrot.lane.b32.xlu0 %v439_v58, %s1985_s16 }
 0x442   :  { %v446_v61 = vpop.permute.xlu1 %445 }
 0x443   :  { %v2142_v62 = vadd.f32 %v446_v61, %v430_v60 }
 0x444   :  { %v444_v2 = vpop.permute.xlu0 %443 }
 0x445   :  { %1777 = vtanh.f32 %v2142_v62  ;;  %v2146_v3 = vadd.f32 %v444_v2, %v429_v1  ;;  %v583_v60 = vrot.slane %v2142_v62, 7 }
 0x447   :  { %1779 = vtanh.f32 %v2146_v3  ;;  %v582_v56 = vrot.slane %v2146_v3, 7 }
 0x448   :  { %1781 = vpow2.f32 %v1529_v6 }
 0x449   :  { %1783 = vpow2.f32 %v1531_v10 }
 0x44f   :  { %v1778_v5 = vpop.eup %1777 }
 0x450   :  { %457 = vrot.lane.b32.xlu1 %v1778_v5, %s1985_s16 }
 0x451   :  { %v1780_v7 = vpop.eup %1779 }
 0x452   :  { %455 = vrot.lane.b32.xlu0 %v1780_v7, %s1985_s16  ;;  %v1782_v12 = vpop.eup %1781 }
 0x453   :  { %v1784_v11 = vpop.eup %1783  ;;  %v410_v13 = vadd.f32 1.0, %v1782_v12 }
 0x454   :  { %v412_v14 = vadd.f32 1.0, %v1784_v11 }
 0x455   :  { %1785 = vrcp.f32 %v410_v13 }
 0x456   :  { %1787 = vrcp.f32 %v412_v14 }
 0x45f   :  { %v1786_v16 = vpop.eup %1785 }
 0x460   :  { %v1788_v21 = vpop.eup %1787 }
 0x4c2   :  { %v458_v18 = vpop.permute.xlu1 %457 }
 0x4c3   :  { %v462_v22 = vmul.f32 %v1788_v21, %v458_v18 }
 0x4c4   :  { %v456_v19 = vpop.permute.xlu0 %455 }
 0x4c5   :  { %v461_v20 = vmul.f32 %v1786_v16, %v456_v19 }
 0x4c7   :  { %v465_v25 = vrot.slane %v461_v20, 1 }
 0x4c9   :  { %v466_v26 = vsel %vm310_vm2, %v462_v22, %v465_v25 }
 0x4ca   :  { %1532 = vmatmul.mubr.msk.f32.vlgmr.msra.gmra.mrb[2].mxu1 %vm160_vm3, %v466_v26 }
 0x4cb   :  { %1659 = vmatpush1.bf16.msra.mxu1 %v2040_v8  ;;  %849 = vmatprep.mubr.f32.mxu1 %v1984_v0 }
 0x4cc   :  { %1661 = vmatprep.subr.bf16.mxu1 %v2042_v9 }
 0x4cf   :  { %1663 = vmatpush1.bf16.msra.mxu1 %v2049_v15 }
 0x4d0   :  { %1665 = vmatprep.subr.bf16.mxu1 %v2052_v17 }
 0x4d3   :  { %1667 = vmatpush1.bf16.msra.mxu1 %v2058_v23 }
 0x4d4   :  { %1669 = vmatprep.subr.bf16.mxu1 %v2062_v24 }
 0x4d7   :  { %1671 = vmatpush1.bf16.msra.mxu1 %v2071_v28 }
 0x4d8   :  { %1689 = vmatprep.subr.bf16.mxu1 %v2038_v4 }
 0x59d   :  { %v535_v27 = vpop.f32.mrb[2].mxu1 }
 0x59e   :  { %v537_v29 = vpop.f32.mrb[3].mxu1  ;;  %v542_v36 = vrot.slane %v535_v27, 6  ;;  %v544_v38 = vrot.slane %v535_v27, 7 }
 0x59f   :  { %v543_v30 = vrot.slane %v537_v29, 6  ;;  %v545_v31 = vrot.slane %v537_v29, 7 }
 0x5a0   :  { %v550_v37 = vadd.f32 %v542_v36, %v2109_v52  ;;  %v552_v41 = vadd.f32 %v544_v38, %v2106_v49 }
 0x5a1   :  { %v551_v32 = vadd.f32 %v543_v30, %v2101_v43  ;;  %v553_v33 = vadd.f32 %v545_v31, %v2098_v39 }
 0x5a2   :  { %v1533_v40 = vmul.f32 -1.442695, %v550_v37  ;;  %v1535_v42 = vmul.f32 -1.442695, %v552_v41 }
 0x5a3   :  { %1789 = vtanh.f32 %v551_v32  ;;  %v1534_v3 = vmul.f32 -1.442695, %v551_v32  ;;  %v1536_v7 = vmul.f32 -1.442695, %v553_v33 }
 0x5a4   :  { %1791 = vtanh.f32 %v553_v33 }
 0x5a5   :  { %1793 = vpow2.f32 %v1533_v40 }
 0x5a6   :  { %1795 = vpow2.f32 %v1535_v42 }
 0x5ad   :  { %v1790_v34 = vpop.eup %1789 }
 0x5ae   :  { %590 = vrot.lane.b32.xlu0 %v1790_v34, %s1985_s16  ;;  %v1792_v35 = vpop.eup %1791 }
 0x5af   :  { %592 = vrot.lane.b32.xlu1 %v1792_v35, %s1985_s16  ;;  %v1794_v44 = vpop.eup %1793 }
 0x5b0   :  { %v566_v45 = vadd.f32 1.0, %v1794_v44  ;;  %v1796_v46 = vpop.eup %1795 }
 0x5b1   :  { %v568_v47 = vadd.f32 1.0, %v1796_v46 }
 0x5b2   :  { %1797 = vrcp.f32 %v566_v45 }
 0x5b3   :  { %1799 = vrcp.f32 %v568_v47 }
 0x5bc   :  { %v1798_v48 = vpop.eup %1797 }
 0x5bd   :  { %v1800_v53 = vpop.eup %1799  ;;  %v586_v57 = vmul.f32 %v1798_v48, %v582_v56 }
 0x5be   :  { %v587_v61 = vmul.f32 %v1800_v53, %v583_v60 }
 0x620   :  { %v591_v50 = vpop.permute.xlu0 %590 }
 0x621   :  { %v596_v51 = vmul.f32 %v1798_v48, %v591_v50  ;;  %v593_v54 = vpop.permute.xlu1 %592 }
 0x622   :  { %v597_v55 = vmul.f32 %v1800_v53, %v593_v54 }
 0x623   :  { %600 = vrot.lane.b32.xlu0 %v596_v51, %s1985_s16 }
 0x624   :  { %602 = vrot.lane.b32.xlu1 %v597_v55, %s1985_s16 }
 0x695   :  { %v601_v58 = vpop.permute.xlu0 %600 }
 0x696   :  { %v2171_v59 = vadd.f32 %v601_v58, %v586_v57  ;;  %v603_v63 = vpop.permute.xlu1 %602 }
 0x697   :  { %v2175_v1 = vadd.f32 %v603_v63, %v587_v61 }
 0x698   :  { %1801 = vtanh.f32 %v2171_v59  ;;  %v740_v53 = vrot.slane %v2171_v59, 7 }
 0x699   :  { %1803 = vtanh.f32 %v2175_v1  ;;  %v741_v57 = vrot.slane %v2175_v1, 7 }
 0x69a   :  { %1805 = vpow2.f32 %v1534_v3 }
 0x69b   :  { %1807 = vpow2.f32 %v1536_v7 }
 0x6a2   :  { %v1802_v2 = vpop.eup %1801 }
 0x6a3   :  { %612 = vrot.lane.b32.xlu0 %v1802_v2, %s1985_s16  ;;  %v1804_v5 = vpop.eup %1803 }
 0x6a4   :  { %614 = vrot.lane.b32.xlu1 %v1804_v5, %s1985_s16  ;;  %v1806_v6 = vpop.eup %1805 }
 0x6a5   :  { %v567_v62 = vadd.f32 1.0, %v1806_v6  ;;  %v1808_v10 = vpop.eup %1807 }
 0x6a6   :  { %v569_v12 = vadd.f32 1.0, %v1808_v10 }
 0x6a7   :  { %1809 = vrcp.f32 %v567_v62 }
 0x6a8   :  { %1811 = vrcp.f32 %v569_v12 }
 0x6b1   :  { %v1810_v13 = vpop.eup %1809 }
 0x6b2   :  { %v1812_v16 = vpop.eup %1811 }
 0x715   :  { %v613_v11 = vpop.permute.xlu0 %612 }
 0x716   :  { %v618_v14 = vmul.f32 %v1810_v13, %v613_v11  ;;  %v615_v18 = vpop.permute.xlu1 %614 }
 0x717   :  { %v619_v19 = vmul.f32 %v1812_v16, %v615_v18 }
 0x718   :  { %v622_v20 = vrot.slane %v618_v14, 2 }
 0x719   :  { %v623_v21 = vrot.slane %v619_v19, 1 }
 0x71b   :  { %v624_v22 = vsel %vm310_vm2, %v623_v21, %v622_v20 }
 0x71c   :  { %1537 = vmatmul.mubr.msk.f32.vlgmr.msra.gmra.mrb[6].mxu0 %vm160_vm3, %v624_v22 }
 0x71d   :  { %1675 = vmatpush1.bf16.msra.mxu0 %v2040_v8  ;;  %1007 = vmatprep.mubr.f32.mxu0 %v1984_v0 }
 0x71e   :  { %1677 = vmatprep.subr.bf16.mxu0 %v2042_v9 }
 0x721   :  { %1679 = vmatpush1.bf16.msra.mxu0 %v2049_v15 }
 0x722   :  { %1681 = vmatprep.subr.bf16.mxu0 %v2052_v17 }
 0x725   :  { %1683 = vmatpush1.bf16.msra.mxu0 %v2058_v23 }
 0x726   :  { %1685 = vmatprep.subr.bf16.mxu0 %v2062_v24 }
 0x729   :  { %1687 = vmatpush1.bf16.msra.mxu0 %v2071_v28 }
 0x72a   :  { %1705 = vmatprep.subr.bf16.mxu0 %v2038_v4 }
 0x7ef   :  { %v693_v25 = vpop.f32.mrb[6].mxu0 }
 0x7f0   :  { %v695_v26 = vpop.f32.mrb[7].mxu0  ;;  %v700_v34 = vrot.slane %v693_v25, 5  ;;  %v702_v4 = vrot.slane %v693_v25, 6 }
 0x7f1   :  { %v701_v27 = vrot.slane %v695_v26, 5  ;;  %v703_v29 = vrot.slane %v695_v26, 6 }
 0x7f2   :  { %v708_v35 = vadd.f32 %v700_v34, %v2109_v52  ;;  %v710_v37 = vadd.f32 %v702_v4, %v2106_v49 }
 0x7f3   :  { %v709_v30 = vadd.f32 %v701_v27, %v2101_v43  ;;  %v711_v31 = vadd.f32 %v703_v29, %v2098_v39 }
 0x7f4   :  { %v1538_v36 = vmul.f32 -1.442695, %v708_v35  ;;  %v1540_v38 = vmul.f32 -1.442695, %v710_v37 }
 0x7f5   :  { %1813 = vtanh.f32 %v709_v30  ;;  %v1539_v59 = vmul.f32 -1.442695, %v709_v30  ;;  %v1541_v5 = vmul.f32 -1.442695, %v711_v31 }
 0x7f6   :  { %1815 = vtanh.f32 %v711_v31 }
 0x7f7   :  { %1817 = vpow2.f32 %v1538_v36 }
 0x7f8   :  { %1819 = vpow2.f32 %v1540_v38 }
 0x7ff   :  { %v1814_v32 = vpop.eup %1813 }
 0x800   :  { %748 = vrot.lane.b32.xlu0 %v1814_v32, %s1985_s16  ;;  %v1816_v33 = vpop.eup %1815 }
 0x801   :  { %750 = vrot.lane.b32.xlu1 %v1816_v33, %s1985_s16  ;;  %v1818_v40 = vpop.eup %1817 }
 0x802   :  { %v724_v41 = vadd.f32 1.0, %v1818_v40  ;;  %v1820_v42 = vpop.eup %1819 }
 0x803   :  { %v726_v44 = vadd.f32 1.0, %v1820_v42 }
 0x804   :  { %1821 = vrcp.f32 %v724_v41 }
 0x805   :  { %1823 = vrcp.f32 %v726_v44 }
 0x80e   :  { %v1822_v45 = vpop.eup %1821 }
 0x80f   :  { %v1824_v48 = vpop.eup %1823  ;;  %v744_v54 = vmul.f32 %v1822_v45, %v740_v53 }
 0x810   :  { %v745_v58 = vmul.f32 %v1824_v48, %v741_v57 }
 0x872   :  { %v749_v46 = vpop.permute.xlu0 %748 }
 0x873   :  { %v754_v47 = vmul.f32 %v1822_v45, %v749_v46  ;;  %v751_v50 = vpop.permute.xlu1 %750 }
 0x874   :  { %v755_v51 = vmul.f32 %v1824_v48, %v751_v50 }
 0x875   :  { %758 = vrot.lane.b32.xlu0 %v754_v47, %s1985_s16 }
 0x876   :  { %760 = vrot.lane.b32.xlu1 %v755_v51, %s1985_s16 }
 0x8e7   :  { %v759_v55 = vpop.permute.xlu0 %758 }
 0x8e8   :  { %v2200_v56 = vadd.f32 %v759_v55, %v744_v54  ;;  %v761_v60 = vpop.permute.xlu1 %760 }
 0x8e9   :  { %v2204_v61 = vadd.f32 %v761_v60, %v745_v58 }
 0x8ea   :  { %1825 = vtanh.f32 %v2200_v56  ;;  %v898_v48 = vrot.slane %v2200_v56, 7 }
 0x8eb   :  { %1827 = vtanh.f32 %v2204_v61  ;;  %v899_v54 = vrot.slane %v2204_v61, 7 }
 0x8ec   :  { %1829 = vpow2.f32 %v1539_v59 }
 0x8ed   :  { %1831 = vpow2.f32 %v1541_v5 }
 0x8f4   :  { %v1826_v63 = vpop.eup %1825 }
 0x8f5   :  { %770 = vrot.lane.b32.xlu0 %v1826_v63, %s1985_s16  ;;  %v1828_v2 = vpop.eup %1827 }
 0x8f6   :  { %772 = vrot.lane.b32.xlu1 %v1828_v2, %s1985_s16  ;;  %v1830_v3 = vpop.eup %1829 }
 0x8f7   :  { %v725_v1 = vadd.f32 1.0, %v1830_v3  ;;  %v1832_v7 = vpop.eup %1831 }
 0x8f8   :  { %v727_v6 = vadd.f32 1.0, %v1832_v7 }
 0x8f9   :  { %1833 = vrcp.f32 %v725_v1 }
 0x8fa   :  { %1835 = vrcp.f32 %v727_v6 }
 0x903   :  { %v1834_v10 = vpop.eup %1833 }
 0x904   :  { %v1836_v11 = vpop.eup %1835 }
 0x967   :  { %v771_v62 = vpop.permute.xlu0 %770 }
 0x968   :  { %v776_v12 = vmul.f32 %v1834_v10, %v771_v62  ;;  %v773_v13 = vpop.permute.xlu1 %772 }
 0x969   :  { %v777_v14 = vmul.f32 %v1836_v11, %v773_v13 }
 0x96a   :  { %v780_v16 = vrot.slane %v776_v12, 3 }
 0x96b   :  { %v781_v18 = vrot.slane %v777_v14, 2 }
 0x96d   :  { %v782_v19 = vsel %vm310_vm2, %v781_v18, %v780_v16 }
 0x96e   :  { %1542 = vmatmul.mubr.msk.f32.vlgmr.msra.gmra.mrb[4].mxu1 %vm160_vm3, %v782_v19 }
 0x96f   :  { %1691 = vmatpush1.bf16.msra.mxu1 %v2040_v8  ;;  %1165 = vmatprep.mubr.f32.mxu1 %v1984_v0 }
 0x970   :  { %1693 = vmatprep.subr.bf16.mxu1 %v2042_v9 }
 0x973   :  { %1695 = vmatpush1.bf16.msra.mxu1 %v2049_v15 }
 0x974   :  { %1697 = vmatprep.subr.bf16.mxu1 %v2052_v17 }
 0x977   :  { %1699 = vmatpush1.bf16.msra.mxu1 %v2058_v23 }
 0x978   :  { %1701 = vmatprep.subr.bf16.mxu1 %v2062_v24 }
 0x97b   :  { %1703 = vmatpush1.bf16.msra.mxu1 %v2071_v28 }
 0xa41   :  { %v851_v20 = vpop.f32.mrb[4].mxu1 }
 0xa42   :  { %v853_v21 = vpop.f32.mrb[5].mxu1  ;;  %v858_v31 = vrot.slane %v851_v20, 4  ;;  %v860_v33 = vrot.slane %v851_v20, 5 }
 0xa43   :  { %v859_v22 = vrot.slane %v853_v21, 4  ;;  %v861_v25 = vrot.slane %v853_v21, 5 }
 0xa44   :  { %v866_v32 = vadd.f32 %v858_v31, %v2109_v52  ;;  %v868_v35 = vadd.f32 %v860_v33, %v2106_v49 }
 0xa45   :  { %v867_v26 = vadd.f32 %v859_v22, %v2101_v43  ;;  %v869_v27 = vadd.f32 %v861_v25, %v2098_v39 }
 0xa46   :  { %v1543_v34 = vmul.f32 -1.442695, %v866_v32  ;;  %v1545_v4 = vmul.f32 -1.442695, %v868_v35 }
 0xa47   :  { %1837 = vtanh.f32 %v867_v26  ;;  %v1544_v56 = vmul.f32 -1.442695, %v867_v26  ;;  %v1546_v2 = vmul.f32 -1.442695, %v869_v27 }
 0xa48   :  { %1839 = vtanh.f32 %v869_v27 }
 0xa49   :  { %1841 = vpow2.f32 %v1543_v34 }
 0xa4a   :  { %1843 = vpow2.f32 %v1545_v4 }
 0xa51   :  { %v1838_v29 = vpop.eup %1837 }
 0xa52   :  { %906 = vrot.lane.b32.xlu0 %v1838_v29, %s1985_s16  ;;  %v1840_v30 = vpop.eup %1839 }
 0xa53   :  { %908 = vrot.lane.b32.xlu1 %v1840_v30, %s1985_s16  ;;  %v1842_v36 = vpop.eup %1841 }
 0xa54   :  { %v882_v37 = vadd.f32 1.0, %v1842_v36  ;;  %v1844_v38 = vpop.eup %1843 }
 0xa55   :  { %v884_v40 = vadd.f32 1.0, %v1844_v38 }
 0xa56   :  { %1845 = vrcp.f32 %v882_v37 }
 0xa57   :  { %1847 = vrcp.f32 %v884_v40 }
 0xa60   :  { %v1846_v41 = vpop.eup %1845 }
 0xa61   :  { %v1848_v45 = vpop.eup %1847  ;;  %v902_v50 = vmul.f32 %v1846_v41, %v898_v48 }
 0xa62   :  { %v903_v55 = vmul.f32 %v1848_v45, %v899_v54 }
 0xac4   :  { %v907_v42 = vpop.permute.xlu0 %906 }
 0xac5   :  { %v912_v44 = vmul.f32 %v1846_v41, %v907_v42  ;;  %v909_v46 = vpop.permute.xlu1 %908 }
 0xac6   :  { %v913_v47 = vmul.f32 %v1848_v45, %v909_v46 }
 0xac7   :  { %916 = vrot.lane.b32.xlu0 %v912_v44, %s1985_s16 }
 0xac8   :  { %918 = vrot.lane.b32.xlu1 %v913_v47, %s1985_s16 }
 0xb39   :  { %v917_v51 = vpop.permute.xlu0 %916 }
 0xb3a   :  { %v2228_v53 = vadd.f32 %v917_v51, %v902_v50  ;;  %v919_v57 = vpop.permute.xlu1 %918 }
 0xb3b   :  { %v2232_v58 = vadd.f32 %v919_v57, %v903_v55 }
 0xb3c   :  { %1849 = vtanh.f32 %v2228_v53  ;;  %v1056_v36 = vrot.slane %v2228_v53, 7 }
 0xb3d   :  { %1851 = vtanh.f32 %v2232_v58  ;;  %v1057_v41 = vrot.slane %v2232_v58, 7 }
 0xb3e   :  { %1853 = vpow2.f32 %v1544_v56 }
 0xb3f   :  { %1855 = vpow2.f32 %v1546_v2 }
 0xb46   :  { %v1850_v60 = vpop.eup %1849 }
 0xb47   :  { %928 = vrot.lane.b32.xlu0 %v1850_v60, %s1985_s16  ;;  %v1852_v63 = vpop.eup %1851 }
 0xb48   :  { %930 = vrot.lane.b32.xlu1 %v1852_v63, %s1985_s16  ;;  %v1854_v59 = vpop.eup %1853 }
 0xb49   :  { %v883_v61 = vadd.f32 1.0, %v1854_v59  ;;  %v1856_v5 = vpop.eup %1855 }
 0xb4a   :  { %v885_v3 = vadd.f32 1.0, %v1856_v5 }
 0xb4b   :  { %1857 = vrcp.f32 %v883_v61 }
 0xb4c   :  { %1859 = vrcp.f32 %v885_v3 }
 0xb55   :  { %v1858_v7 = vpop.eup %1857 }
 0xb56   :  { %v1860_v62 = vpop.eup %1859 }
 0xbb9   :  { %v929_v1 = vpop.permute.xlu0 %928 }
 0xbba   :  { %v934_v6 = vmul.f32 %v1858_v7, %v929_v1  ;;  %v931_v10 = vpop.permute.xlu1 %930 }
 0xbbb   :  { %v935_v12 = vmul.f32 %v1860_v62, %v931_v10 }
 0xbbc   :  { %v938_v11 = vrot.slane %v934_v6, 4 }
 0xbbd   :  { %v939_v13 = vrot.slane %v935_v12, 3 }
 0xbbf   :  { %v940_v14 = vsel %vm310_vm2, %v939_v13, %v938_v11 }
 0xbc0   :  { %1547 = vmatmul.mubr.msk.f32.vlgmr.msra.gmra.mrb[8].mxu0 %vm160_vm3, %v940_v14 }
 0xbc1   :  { %1707 = vmatpush1.bf16.msra.mxu0 %v2040_v8  ;;  %1323 = vmatprep.mubr.f32.mxu0 %v1984_v0 }
 0xbc2   :  { %1709 = vmatprep.subr.bf16.mxu0 %v2042_v9 }
 0xbc5   :  { %1711 = vmatpush1.bf16.msra.mxu0 %v2049_v15 }
 0xbc6   :  { %1713 = vmatprep.subr.bf16.mxu0 %v2052_v17 }
 0xbc9   :  { %1715 = vmatpush1.bf16.msra.mxu0 %v2058_v23 }
 0xbca   :  { %1717 = vmatprep.subr.bf16.mxu0 %v2062_v24 }
 0xbcd   :  { %1719 = vmatpush1.bf16.msra.mxu0 %v2071_v28 }
 0xc93   :  { %v1009_v16 = vpop.f32.mrb[8].mxu0 }
 0xc94   :  { %v1011_v18 = vpop.f32.mrb[9].mxu0  ;;  %v1016_v17 = vrot.slane %v1009_v16, 3  ;;  %v1018_v24 = vrot.slane %v1009_v16, 4 }
 0xc95   :  { %v1017_v19 = vrot.slane %v1011_v18, 3  ;;  %v1019_v20 = vrot.slane %v1011_v18, 4 }
 0xc96   :  { %v1024_v23 = vadd.f32 %v1016_v17, %v2109_v52  ;;  %v1026_v22 = vadd.f32 %v1018_v24, %v2106_v49 }
 0xc97   :  { %v1025_v8 = vadd.f32 %v1017_v19, %v2101_v43  ;;  %v1027_v21 = vadd.f32 %v1019_v20, %v2098_v39 }
 0xc98   :  { %v1548_v28 = vmul.f32 -1.442695, %v1024_v23  ;;  %v1550_v25 = vmul.f32 -1.442695, %v1026_v22 }
 0xc99   :  { %1861 = vtanh.f32 %v1025_v8  ;;  %v1549_v48 = vmul.f32 -1.442695, %v1025_v8  ;;  %v1551_v50 = vmul.f32 -1.442695, %v1027_v21 }
 0xc9a   :  { %1863 = vtanh.f32 %v1027_v21 }
 0xc9b   :  { %1865 = vpow2.f32 %v1548_v28 }
 0xc9c   :  { %1867 = vpow2.f32 %v1550_v25 }
 0xca3   :  { %v1862_v9 = vpop.eup %1861 }
 0xca4   :  { %1064 = vrot.lane.b32.xlu0 %v1862_v9, %s1985_s16  ;;  %v1864_v15 = vpop.eup %1863 }
 0xca5   :  { %1066 = vrot.lane.b32.xlu1 %v1864_v15, %s1985_s16  ;;  %v1866_v26 = vpop.eup %1865 }
 0xca6   :  { %v1040_v27 = vadd.f32 1.0, %v1866_v26  ;;  %v1868_v29 = vpop.eup %1867 }
 0xca7   :  { %v1042_v30 = vadd.f32 1.0, %v1868_v29 }
 0xca8   :  { %1869 = vrcp.f32 %v1040_v27 }
 0xca9   :  { %1871 = vrcp.f32 %v1042_v30 }
 0xcb2   :  { %v1870_v31 = vpop.eup %1869 }
 0xcb3   :  { %v1872_v34 = vpop.eup %1871  ;;  %v1060_v37 = vmul.f32 %v1870_v31, %v1056_v36 }
 0xcb4   :  { %v1061_v42 = vmul.f32 %v1872_v34, %v1057_v41 }
 0xd16   :  { %v1065_v32 = vpop.permute.xlu0 %1064 }
 0xd17   :  { %v1070_v33 = vmul.f32 %v1870_v31, %v1065_v32  ;;  %v1067_v35 = vpop.permute.xlu1 %1066 }
 0xd18   :  { %v1071_v4 = vmul.f32 %v1872_v34, %v1067_v35 }
 0xd19   :  { %1074 = vrot.lane.b32.xlu0 %v1070_v33, %s1985_s16 }
 0xd1a   :  { %1076 = vrot.lane.b32.xlu1 %v1071_v4, %s1985_s16 }
 0xd8b   :  { %v1075_v38 = vpop.permute.xlu0 %1074 }
 0xd8c   :  { %v2256_v40 = vadd.f32 %v1075_v38, %v1060_v37  ;;  %v1077_v44 = vpop.permute.xlu1 %1076 }
 0xd8d   :  { %v2260_v45 = vadd.f32 %v1077_v44, %v1061_v42 }
 0xd8e   :  { %1873 = vtanh.f32 %v2256_v40  ;;  %v1214_v26 = vrot.slane %v2256_v40, 7 }
 0xd8f   :  { %1875 = vtanh.f32 %v2260_v45  ;;  %v1215_v31 = vrot.slane %v2260_v45, 7 }
 0xd90   :  { %1877 = vpow2.f32 %v1549_v48 }
 0xd91   :  { %1879 = vpow2.f32 %v1551_v50 }
 0xd98   :  { %v1874_v46 = vpop.eup %1873 }
 0xd99   :  { %1086 = vrot.lane.b32.xlu0 %v1874_v46, %s1985_s16  ;;  %v1876_v47 = vpop.eup %1875 }
 0xd9a   :  { %1088 = vrot.lane.b32.xlu1 %v1876_v47, %s1985_s16  ;;  %v1878_v51 = vpop.eup %1877 }
 0xd9b   :  { %v1041_v53 = vadd.f32 1.0, %v1878_v51  ;;  %v1880_v54 = vpop.eup %1879 }
 0xd9c   :  { %v1043_v55 = vadd.f32 1.0, %v1880_v54 }
 0xd9d   :  { %1881 = vrcp.f32 %v1041_v53 }
 0xd9e   :  { %1883 = vrcp.f32 %v1043_v55 }
 0xda7   :  { %v1882_v58 = vpop.eup %1881 }
 0xda8   :  { %v1884_v63 = vpop.eup %1883 }
 0xe0b   :  { %v1087_v57 = vpop.permute.xlu0 %1086 }
 0xe0c   :  { %v1092_v60 = vmul.f32 %v1882_v58, %v1087_v57  ;;  %v1089_v56 = vpop.permute.xlu1 %1088 }
 0xe0d   :  { %v1093_v2 = vmul.f32 %v1884_v63, %v1089_v56 }
 0xe0e   :  { %v1096_v59 = vrot.slane %v1092_v60, 5 }
 0xe0f   :  { %v1097_v61 = vrot.slane %v1093_v2, 4 }
 0xe11   :  { %v1098_v5 = vsel %vm310_vm2, %v1097_v61, %v1096_v59 }
 0xe12   :  { %1552 = vmatmul.mubr.msk.f32.vlgmr.msra.gmra.mrb[6].mxu1 %vm160_vm3, %v1098_v5 }
 0xe13   :  { %1589 = vmatprep.mubr.msk.f32.mxu1 %vm1987_vm4, %v1984_v0 }
 0xee5   :  { %v1167_v3 = vpop.f32.mrb[6].mxu1 }
 0xee6   :  { %v1169_v1 = vpop.f32.mrb[7].mxu1  ;;  %v1174_v13 = vrot.slane %v1167_v3, 2  ;;  %v1176_v16 = vrot.slane %v1167_v3, 3 }
 0xee7   :  { %v1175_v7 = vrot.slane %v1169_v1, 2  ;;  %v1177_v6 = vrot.slane %v1169_v1, 3 }
 0xee8   :  { %v1182_v14 = vadd.f32 %v1174_v13, %v2109_v52  ;;  %v1184_v19 = vadd.f32 %v1176_v16, %v2106_v49 }
 0xee9   :  { %v1183_v62 = vadd.f32 %v1175_v7, %v2101_v43  ;;  %v1185_v10 = vadd.f32 %v1177_v6, %v2098_v39 }
 0xeea   :  { %v1553_v18 = vmul.f32 -1.442695, %v1182_v14  ;;  %v1555_v20 = vmul.f32 -1.442695, %v1184_v19  ;;  %v1412_v19 = vld [vmem:[%s2353_s4 + $0x10] sm:$0xff] }
 0xeeb   :  { %1885 = vtanh.f32 %v1183_v62  ;;  %v1554_v36 = vmul.f32 -1.442695, %v1183_v62  ;;  %v1556_v37 = vmul.f32 -1.442695, %v1185_v10 }
 0xeec   :  { %1887 = vtanh.f32 %v1185_v10 }
 0xeed   :  { %1889 = vpow2.f32 %v1553_v18  ;;  %v1411_v18 = vld [vmem:[%s2353_s4 + $0x8] sm:$0xff] }
 0xeee   :  { %1891 = vpow2.f32 %v1555_v20  ;;  %v1986_v20 = vmov 0.0|0.0  }
 0xeef   :  { %1720 = vmatprep.subr.bf16.mxu1 %v1986_v20 }
 0xef5   :  { %v1886_v12 = vpop.eup %1885 }
 0xef6   :  { %1222 = vrot.lane.b32.xlu0 %v1886_v12, %s1985_s16  ;;  %v1888_v11 = vpop.eup %1887 }
 0xef7   :  { %1224 = vrot.lane.b32.xlu1 %v1888_v11, %s1985_s16  ;;  %v1890_v8 = vpop.eup %1889 }
 0xef8   :  { %v1198_v21 = vadd.f32 1.0, %v1890_v8  ;;  %v1892_v9 = vpop.eup %1891 }
 0xef9   :  { %v1200_v15 = vadd.f32 1.0, %v1892_v9 }
 0xefa   :  { %1893 = vrcp.f32 %v1198_v21  ;;  %v1413_v21 = vld [vmem:[%s2353_s4 + $0x18] sm:$0xff] }
 0xefb   :  { %1895 = vrcp.f32 %v1200_v15  ;;  %v1724_v9 = vpack.c.bf16 %v1413_v21, %v1412_v19  ;;  %v1414_v15 = vld [vmem:[%s2353_s4 + $0x20] sm:$0xff] }
 0xf04   :  { %v1894_v17 = vpop.eup %1893 }
 0xf05   :  { %v1896_v28 = vpop.eup %1895  ;;  %v1218_v27 = vmul.f32 %v1894_v17, %v1214_v26 }
 0xf06   :  { %v1219_v32 = vmul.f32 %v1896_v28, %v1215_v31  ;;  %v1416_v31 = vld [vmem:[%s2353_s4 + $0x30] sm:$0xff] }
 0xf68   :  { %v1223_v23 = vpop.permute.xlu0 %1222 }
 0xf69   :  { %v1228_v24 = vmul.f32 %v1894_v17, %v1223_v23  ;;  %v1225_v22 = vpop.permute.xlu1 %1224  ;;  %v1415_v17 = vld [vmem:[%s2353_s4 + $0x28] sm:$0xff] }
 0xf6a   :  { %v1229_v25 = vmul.f32 %v1896_v28, %v1225_v22  ;;  %v1727_v23 = vpack.c.bf16 %v1415_v17, %v1414_v15 }
 0xf6b   :  { %1232 = vrot.lane.b32.xlu0 %v1228_v24, %s1985_s16 }
 0xf6c   :  { %1234 = vrot.lane.b32.xlu1 %v1229_v25, %s1985_s16 }
 0xfdd   :  { %v1233_v29 = vpop.permute.xlu0 %1232 }
 0xfde   :  { %v2276_v30 = vadd.f32 %v1233_v29, %v1218_v27  ;;  %v1235_v33 = vpop.permute.xlu1 %1234 }
 0xfdf   :  { %v2280_v34 = vadd.f32 %v1235_v33, %v1219_v32  ;;  %v1417_v32 = vld [vmem:[%s2353_s4 + $0x38] sm:$0xff] }
 0xfe0   :  { %1897 = vtanh.f32 %v2276_v30  ;;  %v1372_v24 = vrot.slane %v2276_v30, 7 }
 0xfe1   :  { %1899 = vtanh.f32 %v2280_v34  ;;  %v1373_v26 = vrot.slane %v2280_v34, 7 }
 0xfe2   :  { %1901 = vpow2.f32 %v1554_v36 }
 0xfe3   :  { %1903 = vpow2.f32 %v1556_v37 }
 0xfea   :  { %v1898_v35 = vpop.eup %1897 }
 0xfeb   :  { %1244 = vrot.lane.b32.xlu0 %v1898_v35, %s1985_s16  ;;  %v1900_v4 = vpop.eup %1899  ;;  %v1730_v35 = vpack.c.bf16 %v1417_v32, %v1416_v31 }
 0xfec   :  { %1246 = vrot.lane.b32.xlu1 %v1900_v4, %s1985_s16  ;;  %v1902_v38 = vpop.eup %1901 }
 0xfed   :  { %v1199_v40 = vadd.f32 1.0, %v1902_v38  ;;  %v1904_v41 = vpop.eup %1903 }
 0xfee   :  { %v1201_v42 = vadd.f32 1.0, %v1904_v41 }
 0xfef   :  { %1905 = vrcp.f32 %v1199_v40 }
 0xff0   :  { %1907 = vrcp.f32 %v1201_v42 }
 0xff9   :  { %v1906_v45 = vpop.eup %1905 }
 0xffa   :  { %v1908_v47 = vpop.eup %1907 }
0x105d   :  { %v1245_v44 = vpop.permute.xlu0 %1244 }
0x105e   :  { %v1250_v46 = vmul.f32 %v1906_v45, %v1245_v44  ;;  %v1247_v48 = vpop.permute.xlu1 %1246 }
0x105f   :  { %v1251_v50 = vmul.f32 %v1908_v47, %v1247_v48 }
0x1060   :  { %v1254_v51 = vrot.slane %v1250_v46, 6 }
0x1061   :  { %v1255_v53 = vrot.slane %v1251_v50, 5 }
0x1063   :  { %v1256_v54 = vsel %vm310_vm2, %v1255_v53, %v1254_v51  ;;  %v1562_v53 = vld [vmem:[%s2354_s5] ss:$0 sm:$0xff] }
0x1064   :  { %1557 = vmatmul.mubr.msk.f32.vlgmr.msra.gmra.mrb[10].mxu0 %vm160_vm3, %v1256_v54 }
0x1137   :  { %v1325_v55 = vpop.f32.mrb[10].mxu0 }
0x1138   :  { %v1327_v57 = vpop.f32.mrb[11].mxu0  ;;  %v1332_v61 = vrot.slane %v1325_v55, 1  ;;  %v1334_v3 = vrot.slane %v1325_v55, 2 }
0x1139   :  { %v1333_v58 = vrot.slane %v1327_v57, 1  ;;  %v1335_v60 = vrot.slane %v1327_v57, 2 }
0x113a   :  { %v1340_v5 = vadd.f32 %v1332_v61, %v2109_v52 }
0x113b   :  { %v2288_v63 = vadd.f32 %v1333_v58, %v2101_v43  ;;  %v2292_v56 = vadd.f32 %v1335_v60, %v2098_v39  ;;  %v1342_v43 = vadd.f32 %v1334_v3, %v2106_v49  ;;  %v1410_v49 = vld [vmem:[%s2353_s4] sm:$0xff] }
0x113c   :  { %v1558_v1 = vmul.f32 -1.442695, %v1340_v5  ;;  %v1721_v8 = vpack.c.bf16 %v1411_v18, %v1410_v49 }
0x113d   :  { %1909 = vtanh.f32 %v2288_v63  ;;  %v1560_v7 = vmul.f32 -1.442695, %v1342_v43  ;;  %v1559_v4 = vmul.f32 -1.442695, %v2288_v63  ;;  %v1561_v36 = vmul.f32 -1.442695, %v2292_v56 }
0x113e   :  { %1911 = vtanh.f32 %v2292_v56  ;;  %1722 = vmatpush3.bf16.msra.mxu1 %v1721_v8 }
0x113f   :  { %1913 = vpow2.f32 %v1558_v1  ;;  %1723 = vmatprep.subr.bf16.mxu1 %v1986_v20 }
0x1140   :  { %1915 = vpow2.f32 %v1560_v7 }
0x1142   :  { %1725 = vmatpush3.bf16.msra.mxu1 %v1724_v9 }
0x1143   :  { %1726 = vmatprep.subr.bf16.mxu1 %v1986_v20 }
0x1146   :  { %1728 = vmatpush3.bf16.msra.mxu1 %v1727_v23 }
0x1147   :  { %v1910_v2 = vpop.eup %1909  ;;  %1729 = vmatprep.subr.bf16.mxu1 %v1986_v20 }
0x1148   :  { %1380 = vrot.lane.b32.xlu0 %v1910_v2, %s1985_s16  ;;  %v1912_v59 = vpop.eup %1911 }
0x1149   :  { %1382 = vrot.lane.b32.xlu1 %v1912_v59, %s1985_s16  ;;  %v1914_v39 = vpop.eup %1913 }
0x114a   :  { %v1356_v6 = vadd.f32 1.0, %v1914_v39  ;;  %v1916_v62 = vpop.eup %1915  ;;  %1731 = vmatpush3.bf16.msra.mxu1 %v1730_v35 }
0x114b   :  { %v1358_v10 = vadd.f32 1.0, %v1916_v62 }
0x114c   :  { %1917 = vrcp.f32 %v1356_v6 }
0x114d   :  { %1919 = vrcp.f32 %v1358_v10 }
0x1156   :  { %v1918_v12 = vpop.eup %1917 }
0x1157   :  { %v1920_v14 = vpop.eup %1919  ;;  %v1376_v28 = vmul.f32 %v1918_v12, %v1372_v24 }
0x1158   :  { %v1377_v27 = vmul.f32 %v1920_v14, %v1373_v26 }
0x11ba   :  { %v1381_v11 = vpop.permute.xlu0 %1380 }
0x11bb   :  { %v1386_v13 = vmul.f32 %v1918_v12, %v1381_v11  ;;  %v1383_v52 = vpop.permute.xlu1 %1382 }
0x11bc   :  { %v1387_v16 = vmul.f32 %v1920_v14, %v1383_v52 }
0x11bd   :  { %1390 = vrot.lane.b32.xlu0 %v1386_v13, %s1985_s16 }
0x11be   :  { %1392 = vrot.lane.b32.xlu1 %v1387_v16, %s1985_s16 }
0x122f   :  { %v1391_v22 = vpop.permute.xlu0 %1390 }
0x1230   :  { %v1396_v25 = vadd.f32 %v1391_v22, %v1376_v28  ;;  %v1393_v29 = vpop.permute.xlu1 %1392 }
0x1231   :  { %v1397_v33 = vadd.f32 %v1393_v29, %v1377_v27 }
0x1232   :  { %1921 = vtanh.f32 %v1396_v25 }
0x1233   :  { %1923 = vtanh.f32 %v1397_v33 }
0x1234   :  { %1925 = vpow2.f32 %v1559_v4 }
0x1235   :  { %1927 = vpow2.f32 %v1561_v36 }
0x123c   :  { %v1922_v30 = vpop.eup %1921 }
0x123d   :  { %1402 = vrot.lane.b32.xlu0 %v1922_v30, %s1985_s16  ;;  %v1924_v34 = vpop.eup %1923 }
0x123e   :  { %1404 = vrot.lane.b32.xlu1 %v1924_v34, %s1985_s16  ;;  %v1926_v37 = vpop.eup %1925 }
0x123f   :  { %v1357_v38 = vadd.f32 1.0, %v1926_v37  ;;  %v1928_v40 = vpop.eup %1927 }
0x1240   :  { %v1359_v41 = vadd.f32 1.0, %v1928_v40 }
0x1241   :  { %1929 = vrcp.f32 %v1357_v38 }
0x1242   :  { %1931 = vrcp.f32 %v1359_v41 }
0x124b   :  { %v1930_v0 = vpop.eup %1929 }
0x124c   :  { %v1932_v45 = vpop.eup %1931 }
0x12af   :  { %v1403_v42 = vpop.permute.xlu0 %1402 }
0x12b0   :  { %v1408_v44 = vmul.f32 %v1930_v0, %v1403_v42  ;;  %v1405_v46 = vpop.permute.xlu1 %1404 }
0x12b1   :  { %v1409_v47 = vmul.f32 %v1932_v45, %v1405_v46 }
0x12b2   :  { %v1427_v48 = vrot.slane %v1408_v44, 7 }
0x12b3   :  { %v1428_v50 = vrot.slane %v1409_v47, 6 }
0x12b5   :  { %v1429_v51 = vsel %vm310_vm2, %v1428_v50, %v1427_v48 }
0x12b6   :  { %1590 = vmatmul.mubr.msk.f32.vlgmr.msra.gmra.mrb[8].mxu1 %vm160_vm3, %v1429_v51 }
0x1389   :  { %v1498_v54 = vpop.f32.mrb[8].mxu1 }
0x138a   :  { %v1499_v55 = vadd.f32 %v1562_v53, %v1498_v54  ;;  %v1591_v57 = vpop.f32.mrb[9].mxu1 }
0x138c   :  { %1503 = vst.msk [vmem:[#allocation5] sm:$0x3] %vm1502_vm5, %v1499_v55 }
0x138d   :  { %1966 = shalt.err (!%p1963_p12)
}
0x138e   :  { %s1967_s13 = scalar_lea.hbm %s2355_s6, 32 }
0x138f   :  { %p1968_p13 = scmp.ne.s32.totalorder %s2355_s6, %s1967_s13  ;;  %p1971_p0 = scmp.lt.u32.totalorder %s1967_s13, %s2355_s6 }
0x1391   :  { %p1973_p1 = pnand %p1971_p0, %p1968_p13 }
0x1393   :  { %1976 = shalt.err (!%p1973_p1)
}
0x1394   :  { %1513 = dma.vmem_to_hbm [thread:$0]  %s1511_s10, 32, %s2355_s6, [#allocation4]  }
0x1395   :  { %1979 = dma.done.wait [#allocation4], 32  }
0x1396   :  { %1980 = vsyncadd [#allocation4], 4294967264 }
0x1397   :  { %1517 = vsyncpa [#allocation3], 1 }
0x1398   :  { %1518 = vsyncpa [#allocation4], 1 }

</bundles_post_ra>
